<compile_context>
chip_gen: v6e
topology: v6e:2x2x1
jax: 0.10.0
libtpu: 0.0.40
codegen_flags: <defaults>
</compile_context>

<pallas_src>
import functools
import math

import jax
import jax.numpy as jnp
import numpy as np
from jax.experimental import pallas as pl
from jax.experimental.pallas import tpu as pltpu


_SQRT_HALF = 0.7071067811865476


def _fast_recip(y):
    """1/y via EUP approximate reciprocal + one Newton step (~f32 accuracy, no VALU divide)."""
    r = pl.reciprocal(y, approx=True)
    return r * (2.0 - y * r)


def _erf_poly(x):
    """erf(x) via Abramowitz & Stegun 7.1.26 (max abs error 1.5e-7); exp/VPU/EUP ops only."""
    a1, a2, a3, a4, a5 = (0.254829592, -0.284496736, 1.421413741,
                          -1.453152027, 1.061405429)
    p = 0.3275911
    sgn = jnp.where(x < 0.0, -1.0, 1.0).astype(x.dtype)
    ax = jnp.abs(x)
    t = _fast_recip(1.0 + p * ax)
    poly = ((((a5 * t + a4) * t + a3) * t + a2) * t + a1) * t
    return sgn * (1.0 - poly * jnp.exp(-ax * ax))


def _gelu_exact(x):
    # PyTorch F.gelu default == exact (erf-based) GELU.
    return 0.5 * x * (1.0 + _erf_poly(x * _SQRT_HALF))


def _late_fusion_kernel(*refs, method):
    if method == "weighted":
        his_ref, cand_ref, mask_ref, w_ref, b_ref, o_ref = refs
    else:
        his_ref, cand_ref, mask_ref, o_ref = refs

    his = his_ref[...]            # (bt, H, D)  f32 or bf16 (wrapper-cast)
    cand = cand_ref[...]          # (bt, C, D)
    bt, H, D = his.shape

    # (bt, 1, H) compare; jnp.where broadcasts it against (bt, C, H) scores.
    masked0 = mask_ref[...] == 0.0

    if method == "weighted":
        # Linear over the whole block: batch folded into the MXU M dimension.
        lin = jnp.dot(his.reshape(bt * H, D), w_ref[...],
                      preferred_element_type=jnp.float32) + b_ref[...]
        keyed = _gelu_exact(lin).reshape(bt, H, D).astype(his.dtype)
        # Fuse the two cand-side matmuls into one batched einsum over concat(his, keyed).
        rhs = jnp.concatenate([his, keyed], axis=1)                    # (bt, 2H, D)
        both = jnp.einsum("bcd,bhd->bch", cand, rhs,
                          preferred_element_type=jnp.float32)          # (bt, C, 2H)
        dot = both[..., :H]
        dw = jnp.where(masked0, -10000.0, both[..., H:])
        m = jnp.max(dw, axis=-1, keepdims=True)
        e = jnp.exp(dw - m)
        # Unnormalized softmax: one tiny reciprocal instead of a (bt,C,H) divide.
        score = jnp.sum(dot * e, axis=-1) * _fast_recip(jnp.sum(e, axis=-1))
    else:
        dot = jnp.einsum("bcd,bhd->bch", cand, his,
                         preferred_element_type=jnp.float32)           # (bt, C, H)
        if method == "max":
            score = jnp.max(jnp.where(masked0, -jnp.inf, dot), axis=-1)
        else:  # "avg": masked_fill(0) then mean over the FULL his_size (PyTorch semantics)
            score = jnp.sum(jnp.where(masked0, 0.0, dot), axis=-1) * (1.0 / float(H))

    o_ref[...] = score.reshape(o_ref.shape).astype(o_ref.dtype)


def _vmem_capacity_bytes():
    try:
        cap = getattr(pltpu.get_tpu_info(), "vmem_capacity_bytes", None)
        if cap:
            return int(cap)
    except Exception:
        pass
    return 64 << 20   # conservative fallback (v7x per-TC VMEM)


def late_fusion_forward(his_emb, cand_emb, mask=None, *, method,
                        weight=None, bias=None, batch_block=None,
                        matmul_dtype=None):
    """LateFusion forward with PyTorch semantics.

    his_emb: (B, his_size, D)   cand_emb: (B, cand_size, D)   mask: (B, his_size) or None
    weight/bias: nn.Linear params ((D, D) PyTorch (out, in) layout, (D,)) for 'weighted'.
    returns: (B, cand_size) click scores (dtype of his_emb).
    """
    B, H, D = his_emb.shape
    Bc, C, Dc = cand_emb.shape
    assert B == Bc and D == Dc
    out_dtype = his_emb.dtype

    esz = jnp.dtype(matmul_dtype).itemsize if matmul_dtype is not None else 4
    osz = jnp.dtype(out_dtype).itemsize

    # Cast matmul operands in the wrapper: halves HBM DMA bytes when bf16 is requested.
    if matmul_dtype is not None:
        his_emb = his_emb.astype(matmul_dtype)
        cand_emb = cand_emb.astype(matmul_dtype)

    if mask is None:
        mask3 = jnp.ones((B, 1, H), jnp.float32)   # all-valid mask == identical semantics
    else:
        mask3 = jnp.asarray(mask).reshape(B, 1, H).astype(jnp.float32)

    # ---- generation-aware tile sizing ---------------------------------------------------
    cap = _vmem_capacity_bytes()
    budget = min(int(cap * 0.35), 44 << 20)        # ~22 MiB on v7x, ~44 MiB on v5e/v6e
    vmem_limit = min(int(cap * 3 // 4), 100 << 20)

    # Per-batch-item footprint: double-buffered DMA blocks + in-kernel f32 intermediates.
    per_item = 2 * esz * (H * D + C * D) + 2 * 4 * H + 2 * osz * C
    per_item += 4 * 4 * C * H                      # dot / masked select / temporaries
    resident = 0
    if method == "weighted":
        per_item += 4 * 2 * H * D                  # lin + keyed (f32)
        per_item += 3 * esz * H * D                # keyed cast + concat copy
        per_item += 4 * 4 * C * H                  # both / dw / e temporaries
        resident = 2 * (D * D * esz + D * 4)       # VMEM-resident weight + bias (buffered)

    if batch_block is None:
        bt = max(1, (budget - resident) // max(per_item, 1))
    else:
        bt = batch_block
    if B >= 64:
        bt = min(bt, pl.cdiv(B, 4))   # >=4 grid steps: feeds both v7x TCs + DMA pipeline
    bt = min(bt, B)
    if bt < B and bt >= 8:
        bt = (bt // 8) * 8            # sublane-aligned batch tile for the 2-D output block
    n_blocks = pl.cdiv(B, bt)         # ragged last block handled by Pallas (no jnp.pad copy)

    in_specs = [
        pl.BlockSpec((bt, H, D), lambda i: (i, 0, 0)),
        pl.BlockSpec((bt, C, D), lambda i: (i, 0, 0)),
        pl.BlockSpec((bt, 1, H), lambda i: (i, 0, 0)),
    ]
    args = [his_emb, cand_emb, mask3]
    if method == "weighted":
        assert weight is not None and bias is not None
        wt = jnp.transpose(weight)    # (D_in, D_out) so x @ wt == x @ W^T
        if matmul_dtype is not None:
            wt = wt.astype(matmul_dtype)
        in_specs += [
            pl.BlockSpec((D, D), lambda i: (0, 0)),   # constant index map -> stays VMEM resident
            pl.BlockSpec((1, D), lambda i: (0, 0)),
        ]
        args += [wt, bias.reshape(1, D).astype(jnp.float32)]

    # Lane-dense 2-D output (no trailing 1) whenever block-shape constraints allow it.
    if bt == B or bt % 8 == 0:
        out_shape = jax.ShapeDtypeStruct((B, C), out_dtype)
        out_spec = pl.BlockSpec((bt, C), lambda i: (i, 0))
    else:
        out_shape = jax.ShapeDtypeStruct((B, C, 1), out_dtype)
        out_spec = pl.BlockSpec((bt, C, 1), lambda i: (i, 0, 0))

    flops = 2 * B * C * H * D
    transcendentals = 0
    bytes_accessed = esz * B * (H * D + C * D) + 4 * B * H + osz * B * C
    if method == "weighted":
        flops += 2 * B * H * D * D + 2 * B * C * H * D
        transcendentals = B * (H * D + C * H)
        bytes_accessed += esz * D * D + 4 * D

    out = pl.pallas_call(
        functools.partial(_late_fusion_kernel, method=method),
        out_shape=out_shape,
        grid_spec=pl.GridSpec(grid=(n_blocks,), in_specs=in_specs, out_specs=out_spec),
        compiler_params=pltpu.CompilerParams(
            dimension_semantics=("parallel",),
            vmem_limit_bytes=int(vmem_limit)),
        cost_estimate=pl.CostEstimate(
            flops=int(flops), transcendentals=int(transcendentals),
            bytes_accessed=int(bytes_accessed)),
    )(*args)

    return out.reshape(B, C)


class LateFusion:
    """JAX/Pallas port of newsrec LateFusion (weighted / max / avg click scoring)."""

    def __init__(self, fusion_method, input_feat_dim, key=jax.random.PRNGKey(0),
                 matmul_dtype=None):
        if fusion_method not in ("weighted", "max", "avg"):
            raise ValueError(f"Invalid fusion method: {fusion_method}")
        self.method = fusion_method
        self.encoding_dim = input_feat_dim
        self.matmul_dtype = matmul_dtype
        self.weight = None
        self.bias = None
        if fusion_method == "weighted":
            # Deterministic init mirroring PyTorch nn.Linear defaults ((out, in) layout).
            kw, kb = jax.random.split(key)
            bound = 1.0 / math.sqrt(input_feat_dim)
            self.weight = jax.random.uniform(
                kw, (input_feat_dim, input_feat_dim), jnp.float32, -bound, bound)
            self.bias = jax.random.uniform(
                kb, (input_feat_dim,), jnp.float32, -bound, bound)

    def __call__(self, his_emb, cand_emb, mask=None):
        return late_fusion_forward(his_emb, cand_emb, mask, method=self.method,
                                   weight=self.weight, bias=self.bias,
                                   matmul_dtype=self.matmul_dtype)


def _late_fusion_ref(his, cand, mask, method, weight=None, bias=None):
    """Pure-JAX reference (exact erf GELU, highest matmul precision)."""
    hp = jax.lax.Precision.HIGHEST
    dot = jnp.einsum("bcd,bhd->bch", cand, his, precision=hp)
    if method == "weighted":
        lin = jnp.einsum("bhd,ed->bhe", his, weight, precision=hp) + bias
        k = jax.nn.gelu(lin, approximate=False)
        dw = jnp.einsum("bcd,bhd->bch", cand, k, precision=hp)
        if mask is not None:
            dw = jnp.where(mask[:, None, :] == 0, -10000.0, dw)
        p = jax.nn.softmax(dw, axis=-1)
        return jnp.sum(dot * p, axis=-1)
    if method == "max":
        if mask is not None:
            dot = jnp.where(mask[:, None, :] == 0, -jnp.inf, dot)
        return jnp.max(dot, axis=-1)
    if mask is not None:
        dot = jnp.where(mask[:, None, :] == 0, 0.0, dot)
    return jnp.mean(dot, axis=-1)


if __name__ == "__main__":
    key = jax.random.PRNGKey(0)
    k_his, k_cand, k_mask, k_param = jax.random.split(key, 4)

    # Small shapes consistent with the module: batch=2, his_size=8, cand_size=4, D=32.
    B, H, C, D = 2, 8, 4, 32
    his = jax.random.normal(k_his, (B, H, D), jnp.float32)
    cand = jax.random.normal(k_cand, (B, C, D), jnp.float32)
    mask = (jax.random.uniform(k_mask, (B, H)) > 0.35).astype(jnp.float32)
    mask = mask.at[:, 0].set(1.0)   # at least one valid history item per row

    # Exact-parity (f32 matmul) checks for every method, with and without mask.
    for method in ("weighted", "max", "avg"):
        model = LateFusion(method, D, key=k_param)
        for m in (mask, None):
            out = jax.block_until_ready(model(his, cand, m))
            ref = _late_fusion_ref(his, cand, m, method, model.weight, model.bias)
            assert out.shape == (B, C)
            np.testing.assert_allclose(np.asarray(out), np.asarray(ref),
                                       rtol=1e-3, atol=1e-3)

    # bf16-operand fast path smoke check (f32 accumulation; looser tolerance).
    model_bf16 = LateFusion("max", D, key=k_param, matmul_dtype=jnp.bfloat16)
    out_bf16 = jax.block_until_ready(model_bf16(his, cand, mask))
    ref_max = _late_fusion_ref(his, cand, mask, "max")
    np.testing.assert_allclose(np.asarray(out_bf16), np.asarray(ref_max),
                               rtol=5e-2, atol=5e-2)

    print("KERNEL_OK")
</pallas_src>

<mosaic_0001>
module attributes {stable_mosaic.version = 11 : i64} {
  func.func @_late_fusion_kernel(%arg0: i32, %arg1: memref<2x8x32xf32, #tpu.memory_space<vmem>>, %arg2: memref<2x4x32xf32, #tpu.memory_space<vmem>>, %arg3: memref<2x1x8xf32, #tpu.memory_space<vmem>>, %arg4: memref<32x32xf32, #tpu.memory_space<vmem>>, %arg5: memref<1x32xf32, #tpu.memory_space<vmem>>, %arg6: memref<2x4xf32, #tpu.memory_space<vmem>>) attributes {dimension_semantics = [#tpu.dimension_semantics<parallel>], iteration_bounds = array<i64: 1>, scalar_prefetch = 0 : i64, scratch_operands = 0 : i64, tpu.core_type = #tpu.core_type<tc>, window_params = [{transform_indices = @transform_0, window_bounds = array<i64: 2, 8, 32>}, {transform_indices = @transform_1, window_bounds = array<i64: 2, 4, 32>}, {transform_indices = @transform_2, window_bounds = array<i64: 2, 1, 8>}, {pipeline_mode = #tpu.pipeline_mode<synchronous>, transform_indices = @transform_3, window_bounds = array<i64: 32, 32>}, {pipeline_mode = #tpu.pipeline_mode<synchronous>, transform_indices = @transform_4, window_bounds = array<i64: 1, 32>}, {transform_indices = @transform_5, window_bounds = array<i64: 2, 4>}]} {
    %c0 = arith.constant 0 : index
    %c0_0 = arith.constant 0 : index
    %c0_1 = arith.constant 0 : index
    %0 = vector.load %arg1[%c0, %c0_0, %c0_1] : memref<2x8x32xf32, #tpu.memory_space<vmem>>, vector<2x8x32xf32>
    %c0_2 = arith.constant 0 : index
    %c0_3 = arith.constant 0 : index
    %c0_4 = arith.constant 0 : index
    %1 = vector.load %arg2[%c0_2, %c0_3, %c0_4] : memref<2x4x32xf32, #tpu.memory_space<vmem>>, vector<2x4x32xf32>
    %c0_5 = arith.constant 0 : index
    %c0_6 = arith.constant 0 : index
    %c0_7 = arith.constant 0 : index
    %2 = vector.load %arg3[%c0_5, %c0_6, %c0_7] : memref<2x1x8xf32, #tpu.memory_space<vmem>>, vector<2x1x8xf32>
    %cst = arith.constant 0.000000e+00 : f32
    %3 = vector.broadcast %cst : f32 to vector<2x1x8xf32>
    %4 = arith.cmpf oeq, %2, %3 : vector<2x1x8xf32>
    %5 = vector.shape_cast %0 : vector<2x8x32xf32> to vector<16x32xf32>
    %c0_8 = arith.constant 0 : index
    %c0_9 = arith.constant 0 : index
    %6 = vector.load %arg4[%c0_8, %c0_9] : memref<32x32xf32, #tpu.memory_space<vmem>>, vector<32x32xf32>
    %cst_10 = arith.constant dense<0.000000e+00> : vector<16x32xf32>
    %7 = tpu.matmul %5, %6, %cst_10 {dimension_numbers = #tpu.dot_dimension_numbers<[1], [0], [0], [1], [0, 0, 1, 1], [], []>} : vector<16x32xf32>, vector<32x32xf32>, vector<16x32xf32> -> vector<16x32xf32>
    %c0_11 = arith.constant 0 : index
    %c0_12 = arith.constant 0 : index
    %8 = vector.load %arg5[%c0_11, %c0_12] : memref<1x32xf32, #tpu.memory_space<vmem>>, vector<1x32xf32>
    %9 = vector.broadcast %8 : vector<1x32xf32> to vector<16x32xf32>
    %10 = arith.addf %7, %9 : vector<16x32xf32>
    %cst_13 = arith.constant 5.000000e-01 : f32
    %11 = vector.broadcast %cst_13 : f32 to vector<16x32xf32>
    %12 = arith.mulf %11, %10 : vector<16x32xf32>
    %cst_14 = arith.constant 0.707106769 : f32
    %13 = vector.broadcast %cst_14 : f32 to vector<16x32xf32>
    %14 = arith.mulf %10, %13 : vector<16x32xf32>
    %cst_15 = arith.constant 0.000000e+00 : f32
    %15 = vector.broadcast %cst_15 : f32 to vector<16x32xf32>
    %16 = arith.cmpf olt, %14, %15 : vector<16x32xf32>
    %cst_16 = arith.constant -1.000000e+00 : f32
    %cst_17 = arith.constant 1.000000e+00 : f32
    %17 = vector.broadcast %cst_16 : f32 to vector<16x32xf32>
    %18 = vector.broadcast %cst_17 : f32 to vector<16x32xf32>
    %19 = arith.select %16, %17, %18 : vector<16x32xi1>, vector<16x32xf32>
    %20 = math.absf %14 : vector<16x32xf32>
    %cst_18 = arith.constant 0.327591091 : f32
    %21 = vector.broadcast %cst_18 : f32 to vector<16x32xf32>
    %22 = arith.mulf %21, %20 : vector<16x32xf32>
    %cst_19 = arith.constant 1.000000e+00 : f32
    %23 = vector.broadcast %cst_19 : f32 to vector<16x32xf32>
    %24 = arith.addf %23, %22 : vector<16x32xf32>
    %25 = tpu.reciprocal %24 {approx = true} : vector<16x32xf32> -> vector<16x32xf32>
    %26 = arith.mulf %24, %25 : vector<16x32xf32>
    %cst_20 = arith.constant 2.000000e+00 : f32
    %27 = vector.broadcast %cst_20 : f32 to vector<16x32xf32>
    %28 = arith.subf %27, %26 : vector<16x32xf32>
    %29 = arith.mulf %25, %28 : vector<16x32xf32>
    %cst_21 = arith.constant 1.06140542 : f32
    %30 = vector.broadcast %cst_21 : f32 to vector<16x32xf32>
    %31 = arith.mulf %30, %29 : vector<16x32xf32>
    %cst_22 = arith.constant -1.45315206 : f32
    %32 = vector.broadcast %cst_22 : f32 to vector<16x32xf32>
    %33 = arith.addf %31, %32 : vector<16x32xf32>
    %34 = arith.mulf %33, %29 : vector<16x32xf32>
    %cst_23 = arith.constant 1.42141378 : f32
    %35 = vector.broadcast %cst_23 : f32 to vector<16x32xf32>
    %36 = arith.addf %34, %35 : vector<16x32xf32>
    %37 = arith.mulf %36, %29 : vector<16x32xf32>
    %cst_24 = arith.constant -0.284496725 : f32
    %38 = vector.broadcast %cst_24 : f32 to vector<16x32xf32>
    %39 = arith.addf %37, %38 : vector<16x32xf32>
    %40 = arith.mulf %39, %29 : vector<16x32xf32>
    %cst_25 = arith.constant 0.254829586 : f32
    %41 = vector.broadcast %cst_25 : f32 to vector<16x32xf32>
    %42 = arith.addf %40, %41 : vector<16x32xf32>
    %43 = arith.mulf %42, %29 : vector<16x32xf32>
    %cst_26 = arith.constant 0.000000e+00 : f32
    %44 = vector.broadcast %cst_26 : f32 to vector<16x32xf32>
    %45 = arith.subf %44, %20 : vector<16x32xf32>
    %46 = arith.mulf %45, %20 : vector<16x32xf32>
    %47 = math.exp %46 : vector<16x32xf32>
    %48 = arith.mulf %43, %47 : vector<16x32xf32>
    %cst_27 = arith.constant 1.000000e+00 : f32
    %49 = vector.broadcast %cst_27 : f32 to vector<16x32xf32>
    %50 = arith.subf %49, %48 : vector<16x32xf32>
    %51 = arith.mulf %19, %50 : vector<16x32xf32>
    %cst_28 = arith.constant 1.000000e+00 : f32
    %52 = vector.broadcast %cst_28 : f32 to vector<16x32xf32>
    %53 = arith.addf %52, %51 : vector<16x32xf32>
    %54 = arith.mulf %12, %53 : vector<16x32xf32>
    %55 = vector.shape_cast %54 : vector<16x32xf32> to vector<2x8x32xf32>
    %56 = tpu.concatenate %0, %55 in 1 : vector<2x8x32xf32>, vector<2x8x32xf32> -> vector<2x16x32xf32>
    "tpu.trace_start"() <{level = 10 : i32, message = "bcd,bhd->bch"}> : () -> ()
    %cst_29 = arith.constant dense<0.000000e+00> : vector<2x4x16xf32>
    %57 = tpu.matmul %1, %56, %cst_29 {dimension_numbers = #tpu.dot_dimension_numbers<[2], [2], [1], [1], [0, 0, 0, 1, 1, 1], [0], [0]>} : vector<2x4x32xf32>, vector<2x16x32xf32>, vector<2x4x16xf32> -> vector<2x4x16xf32>
    "tpu.trace_stop"() : () -> ()
    %58 = vector.extract_strided_slice %57 {offsets = [0, 0, 0], sizes = [2, 4, 8], strides = [1, 1, 1]} : vector<2x4x16xf32> to vector<2x4x8xf32>
    %59 = vector.extract_strided_slice %57 {offsets = [0, 0, 8], sizes = [2, 4, 8], strides = [1, 1, 1]} : vector<2x4x16xf32> to vector<2x4x8xf32>
    %cst_30 = arith.constant -1.000000e+04 : f32
    %60 = vector.shape_cast %4 : vector<2x1x8xi1> to vector<2x1x8xi1>
    %61 = vector.broadcast %60 : vector<2x1x8xi1> to vector<2x4x8xi1>
    %62 = vector.broadcast %cst_30 : f32 to vector<2x4x8xf32>
    %63 = arith.select %61, %62, %59 : vector<2x4x8xi1>, vector<2x4x8xf32>
    %cst_31 = arith.constant dense<0xFF800000> : vector<2x4xf32>
    %64 = vector.multi_reduction <maximumf>, %63, %cst_31 [2] : vector<2x4x8xf32> to vector<2x4xf32>
    %65 = vector.shape_cast %64 : vector<2x4xf32> to vector<2x4x1xf32>
    %66 = vector.broadcast %65 : vector<2x4x1xf32> to vector<2x4x8xf32>
    %67 = arith.subf %63, %66 : vector<2x4x8xf32>
    %68 = math.exp %67 : vector<2x4x8xf32>
    %69 = arith.mulf %58, %68 : vector<2x4x8xf32>
    %cst_32 = arith.constant dense<0.000000e+00> : vector<2x4xf32>
    %70 = vector.multi_reduction <add>, %69, %cst_32 [2] : vector<2x4x8xf32> to vector<2x4xf32>
    %cst_33 = arith.constant dense<0.000000e+00> : vector<2x4xf32>
    %71 = vector.multi_reduction <add>, %68, %cst_33 [2] : vector<2x4x8xf32> to vector<2x4xf32>
    %72 = tpu.reciprocal %71 {approx = true} : vector<2x4xf32> -> vector<2x4xf32>
    %73 = arith.mulf %71, %72 : vector<2x4xf32>
    %cst_34 = arith.constant 2.000000e+00 : f32
    %74 = vector.broadcast %cst_34 : f32 to vector<2x4xf32>
    %75 = arith.subf %74, %73 : vector<2x4xf32>
    %76 = arith.mulf %72, %75 : vector<2x4xf32>
    %77 = arith.mulf %70, %76 : vector<2x4xf32>
    %c0_35 = arith.constant 0 : index
    %c0_36 = arith.constant 0 : index
    %78 = vector.load %arg6[%c0_35, %c0_36] : memref<2x4xf32, #tpu.memory_space<vmem>>, vector<2x4xf32>
    tpu.vector_store %arg6[%c0_35, %c0_36], %77 {strides = array<i32>} : memref<2x4xf32, #tpu.memory_space<vmem>>, vector<2x4xf32>,
    return
  }
  func.func @transform_0(%arg0: i32) -> (i32, i32, i32) {
    %c0_i32 = arith.constant 0 : i32
    %c0_i32_0 = arith.constant 0 : i32
    %c0_i32_1 = arith.constant 0 : i32
    return %arg0, %c0_i32, %c0_i32_0 : i32, i32, i32
  }
  func.func @transform_1(%arg0: i32) -> (i32, i32, i32) {
    %c0_i32 = arith.constant 0 : i32
    %c0_i32_0 = arith.constant 0 : i32
    %c0_i32_1 = arith.constant 0 : i32
    return %arg0, %c0_i32, %c0_i32_0 : i32, i32, i32
  }
  func.func @transform_2(%arg0: i32) -> (i32, i32, i32) {
    %c0_i32 = arith.constant 0 : i32
    %c0_i32_0 = arith.constant 0 : i32
    %c0_i32_1 = arith.constant 0 : i32
    return %arg0, %c0_i32, %c0_i32_0 : i32, i32, i32
  }
  func.func @transform_3(%arg0: i32) -> (i32, i32) {
    %c0_i32 = arith.constant 0 : i32
    %c0_i32_0 = arith.constant 0 : i32
    %c0_i32_1 = arith.constant 0 : i32
    return %c0_i32, %c0_i32_0 : i32, i32
  }
  func.func @transform_4(%arg0: i32) -> (i32, i32) {
    %c0_i32 = arith.constant 0 : i32
    %c0_i32_0 = arith.constant 0 : i32
    %c0_i32_1 = arith.constant 0 : i32
    return %c0_i32, %c0_i32_0 : i32, i32
  }
  func.func @transform_5(%arg0: i32) -> (i32, i32) {
    %c0_i32 = arith.constant 0 : i32
    %c0_i32_0 = arith.constant 0 : i32
    return %arg0, %c0_i32 : i32, i32
  }
}

</mosaic_0001>

<bundles_post_ra>
// kernel: tpu_custom_call.1
= control target key start
LH: loop header
LB: loop body
LE: loop exit
PB: predicated region body
PF: predicated region fallthrough
CT: control target
= control target key end

     0   :  { %10 = vsyncpa [#allocation3], 0  ;;  %s718_s0 = inlined_call_operand.hbm [shape: f32[2,8,32], index: 0, kind: input, shape index: {}]   ;;  %s719_s1 = inlined_call_operand.hbm [shape: f32[2,4,32], index: 1, kind: input, shape index: {}]   ;;  %s720_s2 = inlined_call_operand.vmem [shape: f32[2,1,8], index: 2, kind: input, shape index: {}]   ;;  %s721_s3 = inlined_call_operand.hbm [shape: f32[32,32], index: 3, kind: input, shape index: {}]   ;;  %s722_s4 = inlined_call_operand.vmem [shape: f32[1,32], index: 4, kind: input, shape index: {}]   ;;  %s723_s5 = inlined_call_operand.hbm [shape: f32[2,4], index: 5, kind: output, shape index: {}]  }
   0x1   :  { %11 = vsyncpa [#allocation6], 0 }
   0x2   :  { %12 = vsyncpa [#allocation4], 0  ;;  %s626_s18 = smov [#allocation5]  }
   0x3   :  { %s30_s19 = sshll.u32 %s626_s18, 4  ;;  %s31_s19 = int_to_ptr.vmem [resolvable:$true] %s30_s19 }
   0x4   :  { %s548_s20 = scalar_lea.vmem %s31_s19, 128  ;;  %p553_p1 = scmp.lt.s32.totalorder %s31_s19, %s31_s19 }
   0x5   :  { %p549_p0 = scmp.ne.s32.totalorder %s31_s19, %s548_s20  ;;  %p554_p2 = scmp.lt.s32.totalorder %s548_s20, %s548_s20 }
   0x7   :  { %p555_p3 = por %p554_p2, %p553_p1 }
   0x9   :  { %p556_p4 = pnand %p555_p3, %p549_p0 }
   0xb   :  { %559 = shalt.err (!%p556_p4)
}
   0xc   :  { %s627_s21 = smov 64   ;;  %s628_s22 = smov 4  }
   0xd   :  { %36 = dma.hbm_to_vmem [thread:$0]  %s719_s1, 128, %s31_s19, [#allocation6], %s627_s21, %s627_s21, %s628_s22  }
   0xe   :  { %s629_s25 = smov [#allocation2]  }
   0xf   :  { %s18_s26 = sshll.u32 %s629_s25, 4  ;;  %s19_s26 = int_to_ptr.vmem [resolvable:$true] %s18_s26 }
  0x10   :  { %s568_s27 = scalar_lea.vmem %s19_s26, 256  ;;  %p573_p6 = scmp.lt.s32.totalorder %s19_s26, %s19_s26 }
  0x11   :  { %p569_p5 = scmp.ne.s32.totalorder %s19_s26, %s568_s27  ;;  %p574_p7 = scmp.lt.s32.totalorder %s568_s27, %s568_s27 }
  0x13   :  { %p575_p8 = por %p574_p7, %p573_p6 }
  0x15   :  { %p576_p9 = pnand %p575_p8, %p569_p5 }
  0x17   :  { %579 = shalt.err (!%p576_p9)
}
  0x18   :  { %s630_s28 = smov 128   ;;  %s631_s29 = smov 8  }
  0x19   :  { %24 = dma.hbm_to_vmem [thread:$0]  %s718_s0, 256, %s19_s26, [#allocation3], %s630_s28, %s630_s28, %s631_s29  }
  0x1a   :  { %s632_s7 = smov [#allocation7]  }
  0x1b   :  { %s44_s8 = sshll.u32 %s632_s7, 4  ;;  %s45_s8 = int_to_ptr.vmem [resolvable:$true] %s44_s8 }
  0x1c   :  { %s588_s1 = scalar_lea.vmem %s45_s8, 512  ;;  %p593_p11 = scmp.lt.s32.totalorder %s45_s8, %s45_s8 }
  0x1d   :  { %p589_p10 = scmp.ne.s32.totalorder %s45_s8, %s588_s1  ;;  %p594_p12 = scmp.lt.s32.totalorder %s588_s1, %s588_s1 }
  0x1f   :  { %p595_p13 = por %p594_p12, %p593_p11 }
  0x21   :  { %p596_p0 = pnand %p595_p13, %p589_p10 }
  0x23   :  { %599 = shalt.err (!%p596_p0)
}
  0x24   :  { %50 = dma.hbm_to_vmem [thread:$0]  %s721_s3, 512, %s45_s8, [#allocation6], %s630_s28, %s630_s28, %s631_s29  }
  0x25   :  { %620 = dma.done.wait [#allocation3], 256  }
  0x26   :  { %621 = vsyncadd [#allocation3], 4294967040 }
  0x27   :  { %622 = dma.done.wait [#allocation6], 640  }
  0x28   :  { %623 = vsyncadd [#allocation6], 4294966656  ;;  %vm81_vm0 = vcmask 261120   ;;  %v73_v0 = vld [vmem:[#allocation7 + $0x18] sm:$0xff]  ;;  %v72_v1 = vld [vmem:[#allocation7 + $0x10] sm:$0xff]  ;;  %v633_v6 = vmov 0.0  }
  0x29   :  { %486 = vmatprep.subr.mxu0 %v73_v0  ;;  %v678_v2 = vld [vmem:[#allocation2] sm:$0xff]  ;;  %v70_v4 = vld [vmem:[#allocation7] sm:$0xff]  ;;  %v682_v5 = vld [vmem:[#allocation2 + $0x8] sm:$0xff]  ;;  %497 = vmatprep.subr.mxu1 %v633_v6  ;;  %vm634_vm1 = vmmov 0   ;;  %v635_v56 = vmov 1.0   ;;  %vm395_vm7 = vcmask 60416  }
  0x2a   :  { %487 = vmatpush3.msra.mxu0 %v73_v0  ;;  %v71_v3 = vld [vmem:[#allocation7 + $0x8] sm:$0xff]  ;;  %494 = vmatprep.mubr.msk.f32.mxu0 %vm81_vm0, %v678_v2  ;;  %vm444_vm9 = vcmask 1041409   ;;  %vm447_vm10 = vcmask 25600  }
  0x2b   :  { %488 = vmatprep.subr.mxu0 %v72_v1  ;;  %501 = vmatprep.mubr.msk.f32.mxu1 %vm634_vm1, %v633_v6  ;;  %v465_v7 = vld [vmem:[%s722_s4] ss:$0 sm:$0xff]  ;;  %s636_s4 = smov 120  }
  0x2c   :  { %489 = vmatpush3.msra.mxu0 %v72_v1 }
  0x2d   :  { %490 = vmatprep.subr.mxu0 %v71_v3 }
  0x2e   :  { %491 = vmatpush3.msra.mxu0 %v71_v3 }
  0x2f   :  { %492 = vmatprep.subr.mxu0 %v70_v4 }
  0x30   :  { %493 = vmatpush3.msra.mxu0 %v70_v4 }
  0x31   :  { %495 = vmatmul.mubr.msk.f32.vlgmr.msra.gmra.mxu0 %vm81_vm0, %v682_v5  ;;  %504 = vmatprep.subr.mxu0 %v633_v6 }
  0x32   :  { %508 = vmatprep.mubr.msk.f32.mxu0 %vm634_vm1, %v633_v6 }
  0xf1   :  { %v496_v8 = vpop.f32.mrf.mxu0 }
  0xf2   :  { %v160_v9 = vadd.f32 %v496_v8, %v465_v7  ;;  %v65_v8 = vld [vmem:[#allocation5 + $0x4] sm:$0xf] }
  0xf3   :  { %v154_v10 = vpop.f32.mrf.mxu0 }
  0xf4   :  { %v166_v11 = vmul.f32 0.70710677, %v160_v9  ;;  %v155_v12 = vadd.f32 %v465_v7, %v154_v10  ;;  %v164_v61 = vmul.f32 0.5, %v160_v9  ;;  %v64_v9 = vld [vmem:[#allocation5] sm:$0xf] }
  0xf6   :  { %v172_v13 = vand.u32 2147483647, %v166_v11  ;;  %v165_v14 = vmul.f32 0.70710677, %v155_v12  ;;  %vm168_vm2 = vcmp.lt.f32.partialorder %v166_v11, 0.0  ;;  %v163_v3 = vmul.f32 0.5, %v155_v12 }
  0xf7   :  { %v170_v57 = vsel %vm168_vm2, -1.0, %v635_v56 }
  0xf8   :  { %v174_v15 = vmul.f32 0.3275911, %v172_v13  ;;  %v171_v16 = vand.u32 2147483647, %v165_v14  ;;  %v204_v20 = vsub.f32 0.0, %v172_v13  ;;  %vm167_vm3 = vcmp.lt.f32.partialorder %v165_v14, 0.0 }
  0xf9   :  { %v169_v63 = vsel %vm167_vm3, -1.0, %v635_v56 }
  0xfa   :  { %v176_v17 = vadd.f32 1.0, %v174_v15  ;;  %v173_v18 = vmul.f32 0.3275911, %v171_v16  ;;  %v203_v23 = vsub.f32 0.0, %v171_v16  ;;  %v206_v26 = vmul.f32 %v204_v20, %v172_v13 }
  0xfc   :  { %524 = vrcp.f32 %v176_v17  ;;  %v175_v19 = vadd.f32 1.0, %v173_v18  ;;  %v205_v30 = vmul.f32 %v203_v23, %v171_v16  ;;  %v209_v32 = vmul.f32 1.442695, %v206_v26 }
  0xfd   :  { %v637_v16 = vmov 0  }
  0xfe   :  { %526 = vrcp.f32 %v175_v19  ;;  %v207_v35 = vmul.f32 1.442695, %v205_v30 }
  0xff   :  { %528 = vpow2.f32 %v209_v32 }
 0x100   :  { %530 = vpow2.f32 %v207_v35 }
 0x109   :  { %v525_v21 = vpop.eup %524 }
 0x10a   :  { %v180_v22 = vmul.f32 %v525_v21, %v176_v17 }
 0x10b   :  { %v527_v24 = vpop.eup %526 }
 0x10c   :  { %v182_v25 = vsub.f32 2.0, %v180_v22  ;;  %v179_v27 = vmul.f32 %v527_v24, %v175_v19  ;;  %v529_v50 = vpop.eup %528 }
 0x10d   :  { %v531_v54 = vpop.eup %530 }
 0x10e   :  { %v184_v28 = vmul.f32 %v525_v21, %v182_v25  ;;  %v181_v29 = vsub.f32 2.0, %v179_v27 }
 0x110   :  { %v186_v31 = vmul.f32 1.0614054, %v184_v28  ;;  %v183_v33 = vmul.f32 %v527_v24, %v181_v29 }
 0x112   :  { %v188_v34 = vadd.f32 -1.4531521, %v186_v31  ;;  %v185_v36 = vmul.f32 1.0614054, %v183_v33 }
 0x114   :  { %v190_v37 = vmul.f32 %v188_v34, %v184_v28  ;;  %v187_v38 = vadd.f32 -1.4531521, %v185_v36 }
 0x116   :  { %v192_v39 = vadd.f32 1.4214138, %v190_v37  ;;  %v189_v40 = vmul.f32 %v187_v38, %v183_v33 }
 0x118   :  { %v194_v41 = vmul.f32 %v192_v39, %v184_v28  ;;  %v191_v42 = vadd.f32 1.4214138, %v189_v40 }
 0x11a   :  { %v196_v43 = vadd.f32 -0.28449672, %v194_v41  ;;  %v193_v44 = vmul.f32 %v191_v42, %v183_v33 }
 0x11c   :  { %v198_v45 = vmul.f32 %v196_v43, %v184_v28  ;;  %v195_v46 = vadd.f32 -0.28449672, %v193_v44 }
 0x11e   :  { %v200_v47 = vadd.f32 0.2548296, %v198_v45  ;;  %v197_v48 = vmul.f32 %v195_v46, %v183_v33 }
 0x120   :  { %v202_v49 = vmul.f32 %v200_v47, %v184_v28  ;;  %v199_v51 = vadd.f32 0.2548296, %v197_v48 }
 0x122   :  { %v212_v52 = vmul.f32 %v529_v50, %v202_v49  ;;  %v201_v53 = vmul.f32 %v199_v51, %v183_v33 }
 0x124   :  { %v214_v55 = vsub.f32 1.0, %v212_v52  ;;  %v211_v58 = vmul.f32 %v531_v54, %v201_v53 }
 0x126   :  { %v216_v59 = vmul.f32 %v214_v55, %v170_v57  ;;  %v213_v60 = vsub.f32 1.0, %v211_v58 }
 0x128   :  { %v218_v62 = vadd.f32 1.0, %v216_v59  ;;  %v215_v0 = vmul.f32 %v213_v60, %v169_v63 }
 0x12a   :  { %v220_v1 = vmul.f32 %v218_v62, %v164_v61  ;;  %v217_v4 = vadd.f32 1.0, %v215_v0 }
 0x12c   :  { %505 = vmatpush3.xpose.msk.msra.mxu0 %vm81_vm0, %v220_v1  ;;  %v219_v7 = vmul.f32 %v217_v4, %v163_v3 }
 0x12d   :  { %506 = vmatprep.subr.mxu0 %v633_v6 }
 0x12e   :  { %498 = vmatpush3.xpose.msk.msra.mxu1 %vm81_vm0, %v219_v7 }
 0x12f   :  { %499 = vmatprep.subr.mxu1 %v633_v6  ;;  %v375_v6 = vlaneseq }
 0x130   :  { %507 = vmatpush3.xpose.msk.msra.mxu0 %vm81_vm0, %v682_v5  ;;  %v66_v5 = vld [vmem:[%s720_s2] sm:$0x1] }
 0x131   :  { %v376_v14 = vshrl.u32 %v375_v6, 7  ;;  %vm68_vm4 = vcmp.eq.f32.partialorder %v66_v5, 0.0  ;;  %v435_v49 = vand.u32 127, %v375_v6 }
 0x132   :  { %500 = vmatpush3.xpose.msk.msra.mxu1 %vm81_vm0, %v678_v2  ;;  %v67_v2 = vld [vmem:[%s720_s2 + $0x1] sm:$0x1]  ;;  %v373_v17 = vsel %vm68_vm4, 1, %v637_v16  ;;  %s638_s2 = smov [#allocation8]  }
 0x133   :  { %509 = vmatmul.mubr.msk.f32.vlgmr.msra.gmra.mxu0 %vm81_vm0, %v65_v8  ;;  %v377_v15 = vsub.s32 0, %v376_v14  ;;  %vm69_vm5 = vcmp.eq.f32.partialorder %v67_v2, 0.0  ;;  %v438_v52 = vsub.s32 %v435_v49, %v376_v14  ;;  %s455_s15 = sshll.u32 %s638_s2, 4  ;;  %s456_s15 = int_to_ptr.vmem [resolvable:$true] %s455_s15 }
 0x134   :  { %v374_v19 = vsel %vm69_vm5, 1, %v637_v16  ;;  %s600_s16 = scalar_lea.vmem %s456_s15, 32  ;;  %p605_p2 = scmp.lt.s32.totalorder %s456_s15, %s456_s15 }
 0x135   :  { %502 = vmatmul.mubr.msk.f32.vlgmr.msra.gmra.mxu1 %vm81_vm0, %v64_v9  ;;  %v378_v18 = vrot.slane %v373_v17, %v377_v15  ;;  %v382_v20 = vrot.slane %v374_v19, %v377_v15  ;;  %p601_p1 = scmp.ne.s32.totalorder %s456_s15, %s600_s16  ;;  %p606_p3 = scmp.lt.s32.totalorder %s600_s16, %s600_s16 }
 0x137   :  { %vm383_vm6 = vcmp.eq.s32.totalorder %v378_v18, 1  ;;  %vm384_vm8 = vcmp.eq.s32.totalorder %v382_v20, 1  ;;  %p607_p4 = por %p606_p3, %p605_p2 }
 0x139   :  { %p608_p5 = pnand %p607_p4, %p601_p1 }
 0x1f3   :  { %v369_v10 = vpop.f32.mrf.mxu0 }
 0x1f5   :  { %v510_v11 = vpop.f32.mrf.mxu0  ;;  %v293_v12 = vpop.f32.mrf.mxu1 }
 0x1f6   :  { %387 = vrot.lane.b32.xlu0 %v293_v12, %s636_s4 }
 0x1f7   :  { %v503_v13 = vpop.f32.mrf.mxu1 }
 0x1fa   :  { %389 = vrot.lane.b32.xlu0 %v369_v10, %s636_s4 }
 0x268   :  { %v388_v21 = vpop.permute.xlu0 %387 }
 0x269   :  { %v393_v22 = vsel %vm383_vm6, -10000.0, %v388_v21 }
 0x26a   :  { %v396_v23 = vsel %vm395_vm7, %v393_v22, -inf }
 0x26b   :  { %397 = vmax.xlane.f32.xlu1 %v396_v23 }
 0x26c   :  { %v390_v24 = vpop.permute.xlu0 %389 }
 0x26d   :  { %v394_v25 = vsel %vm384_vm8, -10000.0, %v390_v24 }
 0x26e   :  { %v399_v26 = vsel %vm395_vm7, %v394_v25, -inf }
 0x26f   :  { %400 = vmax.xlane.f32.xlu1 %v399_v26 }
 0x2f4   :  { %v398_v27 = vpop.xlane.xlu1 %397 }
 0x2f5   :  { %v402_v28 = vsub.f32 %v393_v22, %v398_v27 }
 0x2f7   :  { %v404_v29 = vmul.f32 1.442695, %v402_v28 }
 0x2f8   :  { %v401_v30 = vpop.xlane.xlu1 %400 }
 0x2f9   :  { %532 = vpow2.f32 %v404_v29  ;;  %v403_v31 = vsub.f32 %v394_v25, %v401_v30 }
 0x2fb   :  { %v406_v32 = vmul.f32 1.442695, %v403_v31 }
 0x2fd   :  { %534 = vpow2.f32 %v406_v32 }
 0x306   :  { %v533_v33 = vpop.eup %532 }
 0x307   :  { %v416_v34 = vsel %vm395_vm7, %v533_v33, 0.0  ;;  %v408_v37 = vmul.f32 %v533_v33, %v293_v12 }
 0x308   :  { %417 = vadd.xlane.f32.xlu0 %v416_v34 }
 0x309   :  { %v410_v38 = vsel %vm395_vm7, %v408_v37, 0.0 }
 0x30a   :  { %v535_v35 = vpop.eup %534 }
 0x30b   :  { %v419_v36 = vsel %vm395_vm7, %v535_v35, 0.0  ;;  %v409_v39 = vmul.f32 %v535_v35, %v369_v10 }
 0x30c   :  { %420 = vadd.xlane.f32.xlu1 %v419_v36 }
 0x30d   :  { %v413_v40 = vsel %vm395_vm7, %v409_v39, 0.0 }
 0x310   :  { %411 = vadd.xlane.f32.xlu1 %v410_v38 }
 0x314   :  { %414 = vadd.xlane.f32.xlu1 %v413_v40 }
 0x391   :  { %v418_v41 = vpop.xlane.xlu0 %417 }
 0x392   :  { %536 = vrcp.f32 %v418_v41 }
 0x395   :  { %v421_v42 = vpop.xlane.xlu1 %420 }
 0x396   :  { %538 = vrcp.f32 %v421_v42 }
 0x399   :  { %v412_v47 = vpop.xlane.xlu1 %411 }
 0x39d   :  { %v415_v55 = vpop.xlane.xlu1 %414 }
 0x39f   :  { %v537_v43 = vpop.eup %536 }
 0x3a0   :  { %v424_v44 = vmul.f32 %v537_v43, %v418_v41 }
 0x3a2   :  { %v426_v45 = vsub.f32 2.0, %v424_v44 }
 0x3a3   :  { %v539_v46 = vpop.eup %538 }
 0x3a4   :  { %v425_v48 = vmul.f32 %v539_v46, %v421_v42  ;;  %v428_v50 = vmul.f32 %v537_v43, %v426_v45 }
 0x3a6   :  { %v427_v51 = vsub.f32 2.0, %v425_v48  ;;  %v430_v53 = vmul.f32 %v428_v50, %v412_v47 }
 0x3a8   :  { %v429_v54 = vmul.f32 %v539_v46, %v427_v51  ;;  %v439_v57 = vrot.slane %v430_v53, %v438_v52 }
 0x3aa   :  { %v431_v56 = vmul.f32 %v429_v54, %v415_v55 }
 0x3ac   :  { %v443_v58 = vrot.slane %v431_v56, %v438_v52 }
 0x3ae   :  { %v445_v59 = vsel %vm444_vm9, %v443_v58, %v439_v57 }
 0x3af   :  { %448 = vst.msk [vmem:[#allocation8] sm:$0x3] %vm447_vm10, %v445_v59 }
 0x3b0   :  { %611 = shalt.err (!%p608_p5)
}
 0x3b1   :  { %458 = dma.vmem_to_hbm [thread:$0]  %s456_s15, 32, %s723_s5, [#allocation4]  }
 0x3b2   :  { %624 = dma.done.wait [#allocation4], 32  }
 0x3b3   :  { %625 = vsyncadd [#allocation4], 4294967264 }
 0x3b4   :  { %462 = vsyncpa [#allocation3], 1 }
 0x3b5   :  { %463 = vsyncpa [#allocation6], 1 }
 0x3b6   :  { %464 = vsyncpa [#allocation4], 1 }

</bundles_post_ra>
